<compile_context>
chip_gen: v5e
topology: v5e:2x2
jax: 0.10.0
libtpu: 0.0.40
codegen_flags: <defaults>
</compile_context>

<pallas_src>
import functools

import jax
import jax.numpy as jnp
from jax import lax
from jax.experimental import pallas as pl
from jax.experimental.pallas import tpu as pltpu

NEG_SLOPE = 0.2


def _leaky_relu(x, ns=NEG_SLOPE):
    return jnp.where(x >= 0, x, ns * x)


# ---------------------------------------------------------------------------
# Stage 1: unary_1 (Linear + BN + LeakyReLU) fused with gather-source assembly
# ---------------------------------------------------------------------------
def unary1_kernel(feats_ref, xyz_ref, w1_ref, s1_ref, b1_ref, src_ref):
    x1 = jnp.dot(feats_ref[...], w1_ref[...], preferred_element_type=jnp.float32)
    x1 = _leaky_relu(x1 * s1_ref[...] + b1_ref[...])          # [tile1, d_mid]
    # single full-block store (one row: [xyz | x1])
    src_ref[...] = jnp.concatenate([xyz_ref[...], x1], axis=-1)


# ---------------------------------------------------------------------------
# Stage 2: KPConv + unary_2 + shortcut
# ---------------------------------------------------------------------------
def kpconv_kernel(nbr_ref,                       # SMEM [N*M] int32 (scalar prefetch)
                  src_ref, xyz_ref, feats_ref, kpt_ref, kvw2_ref,
                  b2_ref, ws_ref, ss_ref, bs_ref,
                  out_ref, gbuf,
                  *, tile, n_nbr, n_kpts, d_mid, kp_extent):
    M, K, dm = n_nbr, n_kpts, d_mid
    inv_ext = 1.0 / kp_extent
    base = pl.program_id(0) * (tile * M)

    # ---- index-driven neighbor gather (linear in tile*M) --------------------
    # Shadow neighbors (index == N) hit the zero-padded row of src, so no
    # validity compare / clamp / multiply is needed here.
    def gather_point(n, carry):
        row0 = n * M
        rows = [src_ref[pl.ds(nbr_ref[base + row0 + m], 1), :] for m in range(M)]
        gbuf[pl.ds(pl.multiple_of(row0, M), M), :] = jnp.concatenate(rows, axis=0)
        return carry

    lax.fori_loop(0, tile, gather_point, 0)

    g = gbuf[...]                                 # [tile*M, 3+dm]
    nbr_xyz = g[:, 0:3]
    nbr_feat = g[:, 3:3 + dm]

    # relative coordinates (center each neighborhood on its query point)
    q = xyz_ref[...]                              # [tile, 3]
    rel = (nbr_xyz.reshape(tile, M, 3) - q[:, None, :]).reshape(tile * M, 3)

    # squared distance to every kernel point via the |a-b|^2 expansion
    # (one small MXU matmul instead of K full-size VPU difference tensors)
    kpt = kpt_ref[...]                            # [3, K]
    rel_sq = jnp.sum(rel * rel, axis=1, keepdims=True)          # [tile*M, 1]
    kpt_sq = jnp.sum(kpt * kpt, axis=0, keepdims=True)          # [1, K]
    cross = jnp.dot(rel, kpt, preferred_element_type=jnp.float32)  # [tile*M, K]
    sq = jnp.maximum(rel_sq - 2.0 * cross + kpt_sq, 0.0)

    # linear kernel-point influence (shadow neighbors contribute zero because
    # their gathered features are zero)
    w_lin = jnp.maximum(1.0 - jnp.sqrt(sq) * inv_ext, 0.0)      # [tile*M, K]

    # lane-dense neighbor reduction: [tile, K*dm] result (240 lanes)
    prod = jnp.repeat(w_lin, dm, axis=1) * jnp.tile(nbr_feat, (1, K))  # [tile*M, K*dm]
    wf = jnp.sum(prod.reshape(tile, M, K * dm), axis=1)                # [tile, K*dm]

    # one fused MXU matmul over all kernel points AND unary_2 (kv pre-fused
    # with w2*s2 in the wrapper), then bias + LeakyReLU + shortcut
    out_kp = jnp.dot(wf, kvw2_ref[...], preferred_element_type=jnp.float32)
    x2 = _leaky_relu(out_kp + b2_ref[...])
    sc = (jnp.dot(feats_ref[...], ws_ref[...], preferred_element_type=jnp.float32)
          * ss_ref[...] + bs_ref[...])
    out_ref[...] = x2 + sc


# ---------------------------------------------------------------------------
# Wrapper
# ---------------------------------------------------------------------------
def kpconv_resblock(feats, xyz, neighbor_idx, params, *, point_influence,
                    tile=128, tile1=None):
    N, C_in = feats.shape
    M = neighbor_idx.shape[1]
    K = params['kpt'].shape[1]
    dm, C_out = params['w2'].shape
    c_src = 3 + dm

    if tile1 is None:
        tile1 = min(512, N)                      # stage 1 is purely mem-bound
    tile = min(tile, N)
    # TODO(synk): real point clouds need padding / a ragged last-tile guard.
    assert N % tile == 0 and N % tile1 == 0 and tile % 8 == 0 and tile1 % 8 == 0

    cparams = pltpu.CompilerParams(dimension_semantics=("parallel",),
                                   vmem_limit_bytes=48 * 1024 * 1024)

    # -- stage 1: unary_1 + gather-source assembly, tiled over points ---------
    src = pl.pallas_call(
        unary1_kernel,
        grid=(N // tile1,),
        in_specs=[pl.BlockSpec((tile1, C_in), lambda i: (i, 0)),
                  pl.BlockSpec((tile1, 3), lambda i: (i, 0)),
                  pl.BlockSpec((C_in, dm), lambda i: (0, 0)),
                  pl.BlockSpec((1, dm), lambda i: (0, 0)),
                  pl.BlockSpec((1, dm), lambda i: (0, 0))],
        out_specs=pl.BlockSpec((tile1, c_src), lambda i: (i, 0)),
        out_shape=jax.ShapeDtypeStruct((N, c_src), jnp.float32),
        compiler_params=cparams,
    )(feats, xyz, params['w1'], params['s1'], params['b1'])

    # zero "shadow" rows: neighbor index == N gathers an all-zero row, which
    # replaces the previous per-neighbor validity mask entirely.
    src_pad = jnp.pad(src, ((0, 8), (0, 0)))
    n_src = N + 8

    # fuse the KPConv kernel weights with unary_2's (Linear + BN scale):
    # out = leaky( wf @ kv_flat @ (w2 * s2) + b2 )
    kv_flat = params['kv'].reshape(K * dm, dm)                   # [K*dm, d_mid]
    kvw2 = kv_flat @ (params['w2'] * params['s2'])               # [K*dm, C_out]

    nbr_flat = neighbor_idx.reshape(-1).astype(jnp.int32)

    kernel = functools.partial(
        kpconv_kernel, tile=tile, n_nbr=M, n_kpts=K, d_mid=dm,
        kp_extent=float(point_influence))

    grid_spec = pltpu.PrefetchScalarGridSpec(
        num_scalar_prefetch=1,
        grid=(N // tile,),
        in_specs=[
            # full (padded) gather source resident in VMEM
            # TODO(synk): for large N keep this in HBM (pl.ANY) + DMA gather.
            pl.BlockSpec((n_src, c_src), lambda i, nbr: (0, 0)),
            pl.BlockSpec((tile, 3), lambda i, nbr: (i, 0)),      # query xyz tile
            pl.BlockSpec((tile, C_in), lambda i, nbr: (i, 0)),   # feats tile (shortcut)
            pl.BlockSpec((3, K), lambda i, nbr: (0, 0)),         # kernel points
            pl.BlockSpec((K * dm, C_out), lambda i, nbr: (0, 0)),  # fused kv@(w2*s2)
            pl.BlockSpec((1, C_out), lambda i, nbr: (0, 0)),     # b2
            pl.BlockSpec((C_in, C_out), lambda i, nbr: (0, 0)),  # ws
            pl.BlockSpec((1, C_out), lambda i, nbr: (0, 0)),     # ss
            pl.BlockSpec((1, C_out), lambda i, nbr: (0, 0)),     # bs
        ],
        out_specs=pl.BlockSpec((tile, C_out), lambda i, nbr: (i, 0)),
        scratch_shapes=[pltpu.VMEM((tile * M, c_src), jnp.float32)],
    )

    return pl.pallas_call(
        kernel,
        grid_spec=grid_spec,
        out_shape=jax.ShapeDtypeStruct((N, C_out), jnp.float32),
        compiler_params=cparams,
    )(nbr_flat, src_pad, xyz, feats, params['kpt'], kvw2,
      params['b2'], params['ws'], params['ss'], params['bs'])


# ---------------------------------------------------------------------------
# Pure-JAX reference (inference-mode BN), mirrors the PyTorch forward
# ---------------------------------------------------------------------------
def reference_forward(feats, xyz, nbr, p, point_influence):
    lr = lambda x: jnp.where(x >= 0, x, NEG_SLOPE * x)
    x1 = lr(feats @ p['w1'] * p['s1'] + p['b1'])
    sp = jnp.concatenate([xyz, jnp.full((1, 3), 1e6, jnp.float32)], 0)
    fp = jnp.concatenate([x1, jnp.zeros((1, x1.shape[1]), jnp.float32)], 0)
    nxyz = sp[nbr]                                   # [N, M, 3]
    rel = nxyz - xyz[:, None, :]
    kpts = p['kpt'].T                                # [K, 3]
    diff = rel[:, :, None, :] - kpts[None, None, :, :]
    sq = jnp.sum(diff ** 2, -1)                      # [N, M, K]
    aw = jnp.maximum(1.0 - jnp.sqrt(sq) / point_influence, 0.0)
    aw = jnp.transpose(aw, (0, 2, 1))                # [N, K, M]
    nfeat = fp[nbr]                                  # [N, M, d_mid]
    wf = aw @ nfeat                                  # [N, K, d_mid]
    kout = jnp.einsum('nkd,kdc->nc', wf, p['kv'])
    x2 = lr(kout @ p['w2'] * p['s2'] + p['b2'])
    sc = feats @ p['ws'] * p['ss'] + p['bs']
    return x2 + sc


if __name__ == "__main__":
    N, C_in, C_out, M, K = 128, 32, 64, 16, 15
    d_mid = C_out // 4                        # 16
    prev_grid_size, sigma = 0.3, 1.0
    point_influence = prev_grid_size * sigma  # KP_extent
    kernel_radius = 1.5 * point_influence

    key = jax.random.PRNGKey(0)
    ks = jax.random.split(key, 24)

    feats = jax.random.normal(ks[0], (N, C_in), jnp.float32)
    xyz = jax.random.uniform(ks[1], (N, 3), dtype=jnp.float32) * 0.5
    # indices in [0, N]; value N is the shadow neighbor ("no neighbor")
    neighbor_idx = jax.random.randint(ks[2], (N, M), 0, N + 1, jnp.int32)

    def bn_fold(kg, kb, km, kv_, c):
        gamma = 1.0 + 0.1 * jax.random.normal(kg, (1, c), jnp.float32)
        beta = 0.1 * jax.random.normal(kb, (1, c), jnp.float32)
        mean = 0.1 * jax.random.normal(km, (1, c), jnp.float32)
        var = jax.nn.softplus(jax.random.normal(kv_, (1, c), jnp.float32)) + 0.5
        s = gamma / jnp.sqrt(var + 1e-5)
        b = beta - mean * s
        return s, b

    w1 = jax.random.normal(ks[3], (C_in, d_mid), jnp.float32) / jnp.sqrt(C_in)
    s1, b1 = bn_fold(ks[4], ks[5], ks[6], ks[7], d_mid)
    w2 = jax.random.normal(ks[8], (d_mid, C_out), jnp.float32) / jnp.sqrt(d_mid)
    s2, b2 = bn_fold(ks[9], ks[10], ks[11], ks[12], C_out)
    ws = jax.random.normal(ks[13], (C_in, C_out), jnp.float32) / jnp.sqrt(C_in)
    ss, bs = bn_fold(ks[14], ks[15], ks[16], ks[17], C_out)

    # TODO(synk): real KPConv uses load_kernels() to optimize kernel-point
    # dispositions; here deterministic random points in the kernel ball with
    # the first point fixed at the center (fixed="center").
    dirs = jax.random.normal(ks[18], (K - 1, 3), jnp.float32)
    dirs = dirs / jnp.linalg.norm(dirs, axis=1, keepdims=True)
    radii = jax.random.uniform(ks[19], (K - 1, 1), dtype=jnp.float32) * kernel_radius
    k_points = jnp.concatenate([jnp.zeros((1, 3), jnp.float32), dirs * radii], 0)
    kpt_T = k_points.T                                   # [3, K]

    kv = jax.random.normal(ks[20], (K, d_mid, d_mid), jnp.float32) * jnp.sqrt(
        2.0 / (d_mid + d_mid))

    params = dict(w1=w1, s1=s1, b1=b1, kpt=kpt_T, kv=kv,
                  w2=w2, s2=s2, b2=b2, ws=ws, ss=ss, bs=bs)

    out = kpconv_resblock(feats, xyz, neighbor_idx, params,
                          point_influence=point_influence, tile=128)
    out = jax.block_until_ready(out)

    ref = jax.block_until_ready(
        reference_forward(feats, xyz, neighbor_idx, params, point_influence))

    assert out.shape == (N, C_out)
    assert jnp.allclose(out, ref, atol=2e-2, rtol=2e-2), \
        f"max abs diff {jnp.max(jnp.abs(out - ref))}"

    print("KERNEL_OK")
</pallas_src>

<mosaic_0001>
module attributes {stable_mosaic.version = 11 : i64} {
  func.func @unary1_kernel(%arg0: i32, %arg1: memref<128x32xf32, #tpu.memory_space<vmem>>, %arg2: memref<128x3xf32, #tpu.memory_space<vmem>>, %arg3: memref<32x16xf32, #tpu.memory_space<vmem>>, %arg4: memref<1x16xf32, #tpu.memory_space<vmem>>, %arg5: memref<1x16xf32, #tpu.memory_space<vmem>>, %arg6: memref<128x19xf32, #tpu.memory_space<vmem>>) attributes {dimension_semantics = [#tpu.dimension_semantics<parallel>], iteration_bounds = array<i64: 1>, scalar_prefetch = 0 : i64, scratch_operands = 0 : i64, tpu.core_type = #tpu.core_type<tc>, window_params = [{transform_indices = @transform_0, window_bounds = array<i64: 128, 32>}, {transform_indices = @transform_1, window_bounds = array<i64: 128, 3>}, {pipeline_mode = #tpu.pipeline_mode<synchronous>, transform_indices = @transform_2, window_bounds = array<i64: 32, 16>}, {pipeline_mode = #tpu.pipeline_mode<synchronous>, transform_indices = @transform_3, window_bounds = array<i64: 1, 16>}, {pipeline_mode = #tpu.pipeline_mode<synchronous>, transform_indices = @transform_4, window_bounds = array<i64: 1, 16>}, {transform_indices = @transform_5, window_bounds = array<i64: 128, 19>}]} {
    %c0 = arith.constant 0 : index
    %c0_0 = arith.constant 0 : index
    %0 = vector.load %arg1[%c0, %c0_0] : memref<128x32xf32, #tpu.memory_space<vmem>>, vector<128x32xf32>
    %c0_1 = arith.constant 0 : index
    %c0_2 = arith.constant 0 : index
    %1 = vector.load %arg3[%c0_1, %c0_2] : memref<32x16xf32, #tpu.memory_space<vmem>>, vector<32x16xf32>
    %cst = arith.constant dense<0.000000e+00> : vector<128x16xf32>
    %2 = tpu.matmul %0, %1, %cst {dimension_numbers = #tpu.dot_dimension_numbers<[1], [0], [0], [1], [0, 0, 1, 1], [], []>} : vector<128x32xf32>, vector<32x16xf32>, vector<128x16xf32> -> vector<128x16xf32>
    %c0_3 = arith.constant 0 : index
    %c0_4 = arith.constant 0 : index
    %3 = vector.load %arg4[%c0_3, %c0_4] : memref<1x16xf32, #tpu.memory_space<vmem>>, vector<1x16xf32>
    %4 = vector.broadcast %3 : vector<1x16xf32> to vector<128x16xf32>
    %5 = arith.mulf %2, %4 : vector<128x16xf32>
    %c0_5 = arith.constant 0 : index
    %c0_6 = arith.constant 0 : index
    %6 = vector.load %arg5[%c0_5, %c0_6] : memref<1x16xf32, #tpu.memory_space<vmem>>, vector<1x16xf32>
    %7 = vector.broadcast %6 : vector<1x16xf32> to vector<128x16xf32>
    %8 = arith.addf %5, %7 : vector<128x16xf32>
    %cst_7 = arith.constant 0.000000e+00 : f32
    %9 = vector.broadcast %cst_7 : f32 to vector<128x16xf32>
    %10 = arith.cmpf oge, %8, %9 : vector<128x16xf32>
    %cst_8 = arith.constant 2.000000e-01 : f32
    %11 = vector.broadcast %cst_8 : f32 to vector<128x16xf32>
    %12 = arith.mulf %11, %8 : vector<128x16xf32>
    %13 = arith.select %10, %8, %12 : vector<128x16xi1>, vector<128x16xf32>
    %c0_9 = arith.constant 0 : index
    %c0_10 = arith.constant 0 : index
    %14 = vector.load %arg2[%c0_9, %c0_10] : memref<128x3xf32, #tpu.memory_space<vmem>>, vector<128x3xf32>
    %15 = tpu.concatenate %14, %13 in 1 : vector<128x3xf32>, vector<128x16xf32> -> vector<128x19xf32>
    %c0_11 = arith.constant 0 : index
    %c0_12 = arith.constant 0 : index
    %16 = vector.load %arg6[%c0_11, %c0_12] : memref<128x19xf32, #tpu.memory_space<vmem>>, vector<128x19xf32>
    tpu.vector_store %arg6[%c0_11, %c0_12], %15 {strides = array<i32>} : memref<128x19xf32, #tpu.memory_space<vmem>>, vector<128x19xf32>,
    return
  }
  func.func @transform_0(%arg0: i32) -> (i32, i32) {
    %c0_i32 = arith.constant 0 : i32
    %c0_i32_0 = arith.constant 0 : i32
    return %arg0, %c0_i32 : i32, i32
  }
  func.func @transform_1(%arg0: i32) -> (i32, i32) {
    %c0_i32 = arith.constant 0 : i32
    %c0_i32_0 = arith.constant 0 : i32
    return %arg0, %c0_i32 : i32, i32
  }
  func.func @transform_2(%arg0: i32) -> (i32, i32) {
    %c0_i32 = arith.constant 0 : i32
    %c0_i32_0 = arith.constant 0 : i32
    %c0_i32_1 = arith.constant 0 : i32
    return %c0_i32, %c0_i32_0 : i32, i32
  }
  func.func @transform_3(%arg0: i32) -> (i32, i32) {
    %c0_i32 = arith.constant 0 : i32
    %c0_i32_0 = arith.constant 0 : i32
    %c0_i32_1 = arith.constant 0 : i32
    return %c0_i32, %c0_i32_0 : i32, i32
  }
  func.func @transform_4(%arg0: i32) -> (i32, i32) {
    %c0_i32 = arith.constant 0 : i32
    %c0_i32_0 = arith.constant 0 : i32
    %c0_i32_1 = arith.constant 0 : i32
    return %c0_i32, %c0_i32_0 : i32, i32
  }
  func.func @transform_5(%arg0: i32) -> (i32, i32) {
    %c0_i32 = arith.constant 0 : i32
    %c0_i32_0 = arith.constant 0 : i32
    return %arg0, %c0_i32 : i32, i32
  }
}

</mosaic_0001>

<bundles_post_ra>
// kernel: tpu_custom_call.1
= control target key start
LH: loop header
LB: loop body
LE: loop exit
PB: predicated region body
PF: predicated region fallthrough
CT: control target
= control target key end

     0   :  { %vm40_vm0 = vcmask 261120   ;;  %s684_s2 = inlined_call_operand.vmem [shape: f32[32,16], index: 2, kind: input, shape index: {}]   ;;  %s685_s0 = inlined_call_operand.vmem [shape: f32[128,32], index: 0, kind: input, shape index: {}]   ;;  %s686_s3 = inlined_call_operand.vmem [shape: f32[1,16], index: 3, kind: input, shape index: {}]   ;;  %s687_s4 = inlined_call_operand.vmem [shape: f32[1,16], index: 4, kind: input, shape index: {}]   ;;  %s688_s1 = inlined_call_operand.vmem [shape: f32[128,3], index: 1, kind: input, shape index: {}]   ;;  %s689_s5 = inlined_call_operand.vmem [shape: f32[128,19], index: 5, kind: output, shape index: {}]  }
   0x1   :  { %v39_v0 = vld [vmem:[%s684_s2 + $0x18] sm:$0xff]  ;;  %v38_v1 = vld [vmem:[%s684_s2 + $0x10] sm:$0xff]  ;;  %v37_v2 = vld [vmem:[%s684_s2 + $0x8] sm:$0xff] }
   0x2   :  { %101 = vmatpush.msra.mxu0 %v39_v0  ;;  %376 = vmatpush.msra.mxu1 %v39_v0  ;;  %v36_v3 = vld [vmem:[%s684_s2] sm:$0xff]  ;;  %v21_v8 = vld [vmem:[%s685_s0 + $0x8] sm:$0xff]  ;;  %v22_v12 = vld [vmem:[%s685_s0 + $0x10] sm:$0xff] }
   0x3   :  { %377 = vmatpush.msra.mxu2 %v39_v0  ;;  %378 = vmatpush.msra.mxu3 %v39_v0  ;;  %v20_v4 = vld [vmem:[%s685_s0] sm:$0xff]  ;;  %v29_v9 = vld [vmem:[%s685_s0 + $0x48] sm:$0xff]  ;;  %v30_v13 = vld [vmem:[%s685_s0 + $0x50] sm:$0xff] }
   0x4   :  { %102 = vmatpush.msra.mxu0 %v38_v1  ;;  %379 = vmatpush.msra.mxu1 %v38_v1  ;;  %v24_v5 = vld [vmem:[%s685_s0 + $0x20] sm:$0xff]  ;;  %v25_v10 = vld [vmem:[%s685_s0 + $0x28] sm:$0xff]  ;;  %v26_v14 = vld [vmem:[%s685_s0 + $0x30] sm:$0xff] }
   0x5   :  { %380 = vmatpush.msra.mxu2 %v38_v1  ;;  %381 = vmatpush.msra.mxu3 %v38_v1  ;;  %v28_v6 = vld [vmem:[%s685_s0 + $0x40] sm:$0xff]  ;;  %v33_v11 = vld [vmem:[%s685_s0 + $0x68] sm:$0xff]  ;;  %v34_v15 = vld [vmem:[%s685_s0 + $0x70] sm:$0xff] }
   0x6   :  { %103 = vmatpush.msra.mxu0 %v37_v2  ;;  %382 = vmatpush.msra.mxu1 %v37_v2  ;;  %v32_v7 = vld [vmem:[%s685_s0 + $0x60] sm:$0xff]  ;;  %v23_v16 = vld [vmem:[%s685_s0 + $0x18] sm:$0xff] }
   0x7   :  { %383 = vmatpush.msra.mxu2 %v37_v2  ;;  %384 = vmatpush.msra.mxu3 %v37_v2  ;;  %v31_v17 = vld [vmem:[%s685_s0 + $0x58] sm:$0xff]  ;;  %v501_v20 = vld [vmem:[%s686_s3] ss:$0 sm:$0xff] }
   0x8   :  { %104 = vmatpush.msra.mxu0 %v36_v3  ;;  %385 = vmatpush.msra.mxu1 %v36_v3  ;;  %v27_v18 = vld [vmem:[%s685_s0 + $0x38] sm:$0xff]  ;;  %v506_v21 = vld [vmem:[%s687_s4] ss:$0 sm:$0xff] }
   0x9   :  { %386 = vmatpush.msra.mxu2 %v36_v3  ;;  %360 = vmatmul.msk.f32.vlgmr.msra.gmra.mxu0 %vm40_vm0, %v20_v4  ;;  %v35_v19 = vld [vmem:[%s685_s0 + $0x78] sm:$0xff]  ;;  %s391_s0 = smov 3  }
   0xa   :  { %364 = vmatmul.msk.f32.vlgmr.msra.gmra.mxu1 %vm40_vm0, %v24_v5  ;;  %368 = vmatmul.msk.f32.vlgmr.msra.gmra.mxu2 %vm40_vm0, %v28_v6 }
   0xb   :  { %387 = vmatpush.msra.mxu3 %v36_v3 }
   0xc   :  { %372 = vmatmul.msk.f32.vlgmr.msra.gmra.mxu3 %vm40_vm0, %v32_v7 }
  0x11   :  { %361 = vmatmul.msk.f32.gmra.mxu0 %vm40_vm0, %v21_v8 }
  0x12   :  { %369 = vmatmul.msk.f32.gmra.mxu2 %vm40_vm0, %v29_v9  ;;  %365 = vmatmul.msk.f32.gmra.mxu1 %vm40_vm0, %v25_v10 }
  0x14   :  { %373 = vmatmul.msk.f32.gmra.mxu3 %vm40_vm0, %v33_v11 }
  0x19   :  { %362 = vmatmul.msk.f32.gmra.mxu0 %vm40_vm0, %v22_v12 }
  0x1a   :  { %370 = vmatmul.msk.f32.gmra.mxu2 %vm40_vm0, %v30_v13  ;;  %366 = vmatmul.msk.f32.gmra.mxu1 %vm40_vm0, %v26_v14 }
  0x1c   :  { %374 = vmatmul.msk.f32.gmra.mxu3 %vm40_vm0, %v34_v15 }
  0x21   :  { %363 = vmatmul.msk.f32.gmra.mxu0 %vm40_vm0, %v23_v16 }
  0x22   :  { %371 = vmatmul.msk.f32.gmra.mxu2 %vm40_vm0, %v31_v17  ;;  %367 = vmatmul.msk.f32.gmra.mxu1 %vm40_vm0, %v27_v18 }
  0x24   :  { %375 = vmatmul.msk.f32.gmra.mxu3 %vm40_vm0, %v35_v19 }
  0x86   :  { %v106_v22 = vpop.f32.mrf.mxu0 }
  0x87   :  { %v158_v23 = vmul.f32 %v501_v20, %v106_v22  ;;  %v118_v24 = vpop.f32.mrf.mxu1 }
  0x88   :  { %v162_v25 = vmul.f32 %v501_v20, %v118_v24 }
  0x89   :  { %v178_v26 = vadd.f32 %v506_v21, %v158_v23 }
  0x8a   :  { %v182_v27 = vadd.f32 %v506_v21, %v162_v25 }
  0x8b   :  { %vm194_vm1 = vcmp.ge.f32.partialorder %v178_v26, 0.0  ;;  %v210_v28 = vmul.f32 0.2, %v178_v26 }
  0x8c   :  { %vm198_vm2 = vcmp.ge.f32.partialorder %v182_v27, 0.0  ;;  %v214_v29 = vmul.f32 0.2, %v182_v27 }
  0x8d   :  { %v130_v30 = vpop.f32.mrf.mxu2  ;;  %v226_v31 = vsel %vm194_vm1, %v178_v26, %v210_v28  ;;  %vm322_vm1 = vcmask 23552  }
  0x8e   :  { %v166_v32 = vmul.f32 %v501_v20, %v130_v30  ;;  %v230_v33 = vsel %vm198_vm2, %v182_v27, %v214_v29  ;;  %274 = vrot.lane.b32.xlu0 %v226_v31, %s391_s0  ;;  %v109_v34 = vpop.f32.mrf.mxu0  ;;  %vm339_vm2 = vcmask 154624  }
  0x8f   :  { %v142_v35 = vpop.f32.mrf.mxu3  ;;  %282 = vrot.lane.b32.xlu2 %v230_v33, %s391_s0  ;;  %v121_v36 = vpop.f32.mrf.mxu1  ;;  %v159_v41 = vmul.f32 %v501_v20, %v109_v34 }
  0x90   :  { %v186_v37 = vadd.f32 %v506_v21, %v166_v32  ;;  %v170_v38 = vmul.f32 %v501_v20, %v142_v35  ;;  %v163_v39 = vmul.f32 %v501_v20, %v121_v36 }
  0x91   :  { %v179_v46 = vadd.f32 %v506_v21, %v159_v41  ;;  %v250_v41 = vld [vmem:[%s688_s1 + $0x40] sm:$0xff] }
  0x92   :  { %v190_v40 = vadd.f32 %v506_v21, %v170_v38  ;;  %v218_v42 = vmul.f32 0.2, %v186_v37  ;;  %vm202_vm3 = vcmp.ge.f32.partialorder %v186_v37, 0.0  ;;  %v183_v44 = vadd.f32 %v506_v21, %v163_v39 }
  0x93   :  { %v211_v55 = vmul.f32 0.2, %v179_v46  ;;  %vm195_vm6 = vcmp.ge.f32.partialorder %v179_v46, 0.0 }
  0x94   :  { %vm206_vm4 = vcmp.ge.f32.partialorder %v190_v40, 0.0  ;;  %v222_v43 = vmul.f32 0.2, %v190_v40  ;;  %v234_v47 = vsel %vm202_vm3, %v186_v37, %v218_v42  ;;  %v215_v52 = vmul.f32 0.2, %v183_v44 }
  0x95   :  { %v133_v45 = vpop.f32.mrf.mxu2  ;;  %vm199_vm5 = vcmp.ge.f32.partialorder %v183_v44, 0.0  ;;  %v227_v63 = vsel %vm195_vm6, %v179_v46, %v211_v55 }
  0x96   :  { %v238_v48 = vsel %vm206_vm4, %v190_v40, %v222_v43  ;;  %v112_v49 = vpop.f32.mrf.mxu0  ;;  %v167_v54 = vmul.f32 %v501_v20, %v133_v45  ;;  %v231_v57 = vsel %vm199_vm5, %v183_v44, %v215_v52  ;;  %v247_v44 = vld [vmem:[%s688_s1 + $0x28] sm:$0xff]  ;;  %v254_v52 = vld [vmem:[%s688_s1 + $0x60] sm:$0xff] }
  0x97   :  { %290 = vrot.lane.b32.xlu2 %v234_v47, %s391_s0  ;;  %298 = vrot.lane.b32.xlu0 %v238_v48, %s391_s0  ;;  %v160_v50 = vmul.f32 %v501_v20, %v112_v49  ;;  %v145_v51 = vpop.f32.mrf.mxu3  ;;  %v124_v58 = vpop.f32.mrf.mxu1  ;;  %v242_v47 = vld [vmem:[%s688_s1] sm:$0xff] }
  0x98   :  { %v187_v61 = vadd.f32 %v506_v21, %v167_v54  ;;  %v164_v4 = vmul.f32 %v501_v20, %v124_v58  ;;  %v171_v32 = vmul.f32 %v501_v20, %v145_v51 }
  0x99   :  { %v180_v53 = vadd.f32 %v506_v21, %v160_v50  ;;  %v253_v50 = vld [vmem:[%s688_s1 + $0x58] sm:$0xff] }
  0x9a   :  { %v219_v5 = vmul.f32 0.2, %v187_v61  ;;  %vm203_vm9 = vcmp.ge.f32.partialorder %v187_v61, 0.0  ;;  %v184_v9 = vadd.f32 %v506_v21, %v164_v4  ;;  %v191_v36 = vadd.f32 %v506_v21, %v171_v32 }
  0x9b   :  { %vm196_vm7 = vcmp.ge.f32.partialorder %v180_v53, 0.0  ;;  %v212_v56 = vmul.f32 0.2, %v180_v53 }
  0x9c   :  { %v235_v12 = vsel %vm203_vm9, %v187_v61, %v219_v5  ;;  %v216_v19 = vmul.f32 0.2, %v184_v9  ;;  %vm200_vm12 = vcmp.ge.f32.partialorder %v184_v9, 0.0  ;;  %v223_v38 = vmul.f32 0.2, %v191_v36 }
  0x9d   :  { %v136_v59 = vpop.f32.mrf.mxu2  ;;  %v228_v60 = vsel %vm196_vm7, %v180_v53, %v212_v56  ;;  %vm207_vm0 = vcmp.ge.f32.partialorder %v191_v36, 0.0  ;;  %v256_v56 = vld [vmem:[%s688_s1 + $0x70] sm:$0xff] }
  0x9e   :  { %v168_v62 = vmul.f32 %v501_v20, %v136_v59  ;;  %278 = vrot.lane.b32.xlu1 %v228_v60, %s391_s0  ;;  %v115_v0 = vpop.f32.mrf.mxu0  ;;  %v232_v29 = vsel %vm200_vm12, %v184_v9, %v216_v19  ;;  %v239_v39 = vsel %vm207_vm0, %v191_v36, %v223_v38  ;;  %v243_v59 = vld [vmem:[%s688_s1 + $0x8] sm:$0xff] }
  0x9f   :  { %276 = vrot.lane.b32.xlu0 %v227_v63, %s391_s0  ;;  %284 = vrot.lane.b32.xlu2 %v231_v57, %s391_s0  ;;  %v148_v1 = vpop.f32.mrf.mxu3  ;;  %v161_v3 = vmul.f32 %v501_v20, %v115_v0  ;;  %v127_v14 = vpop.f32.mrf.mxu1  ;;  %v244_v57 = vld [vmem:[%s688_s1 + $0x10] sm:$0xff]  ;;  %v255_v19 = vld [vmem:[%s688_s1 + $0x68] sm:$0xff] }
  0xa0   :  { %v188_v2 = vadd.f32 %v506_v21, %v168_v62  ;;  %v172_v13 = vmul.f32 %v501_v20, %v148_v1  ;;  %v165_v18 = vmul.f32 %v501_v20, %v127_v14  ;;  %v252_v1 = vld [vmem:[%s688_s1 + $0x50] sm:$0xff]  ;;  %v257_v14 = vld [vmem:[%s688_s1 + $0x78] sm:$0xff] }
  0xa1   :  { %v181_v8 = vadd.f32 %v506_v21, %v161_v3 }
  0xa2   :  { %vm204_vm8 = vcmp.ge.f32.partialorder %v188_v2, 0.0  ;;  %v220_v6 = vmul.f32 0.2, %v188_v2  ;;  %v192_v23 = vadd.f32 %v506_v21, %v172_v13  ;;  %v185_v27 = vadd.f32 %v506_v21, %v165_v18  ;;  %v249_v13 = vld [vmem:[%s688_s1 + $0x38] sm:$0xff] }
  0xa3   :  { %v213_v22 = vmul.f32 0.2, %v181_v8  ;;  %vm197_vm11 = vcmp.ge.f32.partialorder %v181_v8, 0.0 }
  0xa4   :  { %v236_v10 = vsel %vm204_vm8, %v188_v2, %v220_v6  ;;  %v224_v30 = vmul.f32 0.2, %v192_v23  ;;  %vm208_vm13 = vcmp.ge.f32.partialorder %v192_v23, 0.0  ;;  %v217_v33 = vmul.f32 0.2, %v185_v27  ;;  %v251_v2 = vld [vmem:[%s688_s1 + $0x48] sm:$0xff] }
  0xa5   :  { %v139_v7 = vpop.f32.mrf.mxu2  ;;  %v229_v28 = vsel %vm197_vm11, %v181_v8, %v213_v22  ;;  %vm201_vm15 = vcmp.ge.f32.partialorder %v185_v27, 0.0  ;;  %v248_v8 = vld [vmem:[%s688_s1 + $0x30] sm:$0xff] }
  0xa6   :  { %v169_v11 = vmul.f32 %v501_v20, %v139_v7  ;;  %294 = vrot.lane.b32.xlu1 %v236_v10, %s391_s0  ;;  %v240_v34 = vsel %vm208_vm13, %v192_v23, %v224_v30  ;;  %v233_v37 = vsel %vm201_vm15, %v185_v27, %v217_v33  ;;  %v245_v7 = vld [vmem:[%s688_s1 + $0x18] sm:$0xff] }
  0xa7   :  { %292 = vrot.lane.b32.xlu0 %v235_v12, %s391_s0  ;;  %v151_v15 = vpop.f32.mrf.mxu3 }
  0xa8   :  { %v189_v16 = vadd.f32 %v506_v21, %v169_v11  ;;  %v173_v17 = vmul.f32 %v501_v20, %v151_v15  ;;  %v246_v20 = vld [vmem:[%s688_s1 + $0x20] sm:$0xff] }
  0xaa   :  { %vm205_vm10 = vcmp.ge.f32.partialorder %v189_v16, 0.0  ;;  %v221_v24 = vmul.f32 0.2, %v189_v16  ;;  %v193_v26 = vadd.f32 %v506_v21, %v173_v17 }
  0xac   :  { %v237_v25 = vsel %vm205_vm10, %v189_v16, %v221_v24  ;;  %v225_v31 = vmul.f32 0.2, %v193_v26  ;;  %vm209_vm14 = vcmp.ge.f32.partialorder %v193_v26, 0.0 }
  0xad   :  { %296 = vrot.lane.b32.xlu2 %v237_v25, %s391_s0 }
  0xae   :  { %280 = vrot.lane.b32.xlu1 %v229_v28, %s391_s0  ;;  %v241_v35 = vsel %vm209_vm14, %v193_v26, %v225_v31 }
  0xaf   :  { %286 = vrot.lane.b32.xlu0 %v232_v29, %s391_s0 }
  0xb5   :  { %302 = vrot.lane.b32.xlu2 %v240_v34, %s391_s0 }
  0xb6   :  { %288 = vrot.lane.b32.xlu1 %v233_v37, %s391_s0 }
  0xb7   :  { %304 = vrot.lane.b32.xlu0 %v241_v35, %s391_s0 }
  0xbe   :  { %300 = vrot.lane.b32.xlu1 %v239_v39, %s391_s0 }
  0xe9   :  { %v283_v40 = vpop.permute.xlu2 %282 }
  0xea   :  { %v327_v21 = vsel %vm322_vm1, %v246_v20, %v283_v40 }
  0xeb   :  { %344 = vst.msk [vmem:[%s689_s5 + $0x20] sm:$0xff] %vm339_vm2, %v327_v21 }
  0xf1   :  { %v291_v42 = vpop.permute.xlu2 %290 }
  0xf2   :  { %v331_v43 = vsel %vm322_vm1, %v250_v41, %v291_v42 }
  0xf3   :  { %348 = vst.msk [vmem:[%s689_s5 + $0x40] sm:$0xff] %vm339_vm2, %v331_v43 }
  0xf9   :  { %v285_v45 = vpop.permute.xlu2 %284 }
  0xfa   :  { %v328_v46 = vsel %vm322_vm1, %v247_v44, %v285_v45 }
  0xfb   :  { %345 = vst.msk [vmem:[%s689_s5 + $0x28] sm:$0xff] %vm339_vm2, %v328_v46 }
 0x100   :  { %v275_v48 = vpop.permute.xlu0 %274 }
 0x101   :  { %v323_v49 = vsel %vm322_vm1, %v242_v47, %v275_v48 }
 0x102   :  { %340 = vst.msk [vmem:[%s689_s5] sm:$0xff] %vm339_vm2, %v323_v49 }
 0x107   :  { %v297_v51 = vpop.permute.xlu2 %296 }
 0x108   :  { %v334_v53 = vsel %vm322_vm1, %v253_v50, %v297_v51 }
 0x109   :  { %351 = vst.msk [vmem:[%s689_s5 + $0x58] sm:$0xff] %vm339_vm2, %v334_v53  ;;  %v299_v54 = vpop.permute.xlu0 %298 }
 0x10a   :  { %v335_v55 = vsel %vm322_vm1, %v254_v52, %v299_v54 }
 0x10b   :  { %352 = vst.msk [vmem:[%s689_s5 + $0x60] sm:$0xff] %vm339_vm2, %v335_v55 }
 0x10f   :  { %v303_v58 = vpop.permute.xlu2 %302 }
 0x110   :  { %v337_v60 = vsel %vm322_vm1, %v256_v56, %v303_v58  ;;  %v279_v61 = vpop.permute.xlu1 %278 }
 0x111   :  { %354 = vst.msk [vmem:[%s689_s5 + $0x70] sm:$0xff] %vm339_vm2, %v337_v60  ;;  %v277_v62 = vpop.permute.xlu0 %276  ;;  %v325_v63 = vsel %vm322_vm1, %v244_v57, %v279_v61 }
 0x112   :  { %v324_v0 = vsel %vm322_vm1, %v243_v59, %v277_v62  ;;  %342 = vst.msk [vmem:[%s689_s5 + $0x10] sm:$0xff] %vm339_vm2, %v325_v63 }
 0x113   :  { %341 = vst.msk [vmem:[%s689_s5 + $0x8] sm:$0xff] %vm339_vm2, %v324_v0 }
 0x118   :  { %v295_v3 = vpop.permute.xlu1 %294 }
 0x119   :  { %v293_v4 = vpop.permute.xlu0 %292  ;;  %v333_v5 = vsel %vm322_vm1, %v252_v1, %v295_v3 }
 0x11a   :  { %v332_v6 = vsel %vm322_vm1, %v251_v2, %v293_v4  ;;  %350 = vst.msk [vmem:[%s689_s5 + $0x50] sm:$0xff] %vm339_vm2, %v333_v5 }
 0x11b   :  { %349 = vst.msk [vmem:[%s689_s5 + $0x48] sm:$0xff] %vm339_vm2, %v332_v6 }
 0x120   :  { %v281_v9 = vpop.permute.xlu1 %280 }
 0x121   :  { %v287_v10 = vpop.permute.xlu0 %286  ;;  %v326_v11 = vsel %vm322_vm1, %v245_v7, %v281_v9 }
 0x122   :  { %v329_v12 = vsel %vm322_vm1, %v248_v8, %v287_v10  ;;  %343 = vst.msk [vmem:[%s689_s5 + $0x18] sm:$0xff] %vm339_vm2, %v326_v11 }
 0x123   :  { %346 = vst.msk [vmem:[%s689_s5 + $0x30] sm:$0xff] %vm339_vm2, %v329_v12 }
 0x128   :  { %v289_v15 = vpop.permute.xlu1 %288 }
 0x129   :  { %v330_v16 = vsel %vm322_vm1, %v249_v13, %v289_v15  ;;  %v305_v17 = vpop.permute.xlu0 %304 }
 0x12a   :  { %347 = vst.msk [vmem:[%s689_s5 + $0x38] sm:$0xff] %vm339_vm2, %v330_v16  ;;  %v338_v18 = vsel %vm322_vm1, %v257_v14, %v305_v17 }
 0x12b   :  { %355 = vst.msk [vmem:[%s689_s5 + $0x78] sm:$0xff] %vm339_vm2, %v338_v18 }
 0x130   :  { %v301_v22 = vpop.permute.xlu1 %300 }
 0x131   :  { %v336_v23 = vsel %vm322_vm1, %v255_v19, %v301_v22 }
 0x132   :  { %353 = vst.msk [vmem:[%s689_s5 + $0x68] sm:$0xff] %vm339_vm2, %v336_v23 }

</bundles_post_ra>
